<compile_context>
chip_gen: v7x
topology: tpu7x:2x2x1
jax: 0.10.0
libtpu: 0.0.40
codegen_flags: <defaults>
</compile_context>

<pallas_src>
import math
import functools

import jax
import jax.numpy as jnp
from jax.experimental import pallas as pl
from jax.experimental.pallas import tpu as pltpu


def _attention_head_kernel(x_ref, wq_ref, bq_ref, wk_ref, bk_ref,
                           wv_ref, bv_ref, out_ref, probs_ref, *, matmul_dtype):
    # x_ref:     (TB, S, H)   TB batch elements per grid step
    # w*_ref:    (H, D)       projection weights (already transposed to H x D;
    #                         wq/bq carry the folded 1/sqrt(D) scale)
    # b*_ref:    (1, D)
    # out_ref:   (TB, S, D)
    # probs_ref: (TB, S, S)
    tb, s, h = x_ref.shape
    d = wq_ref.shape[1]

    # Projections: flatten batch*seq into one matmul per weight (bf16 operands,
    # f32 accumulation on the MXU), bias add in f32.
    x2 = x_ref[...].reshape(tb * s, h).astype(matmul_dtype)       # (TB*S, H)
    wq = wq_ref[...].astype(matmul_dtype)
    wk = wk_ref[...].astype(matmul_dtype)
    wv = wv_ref[...].astype(matmul_dtype)

    q = (jnp.dot(x2, wq, preferred_element_type=jnp.float32)
         + bq_ref[...]).reshape(tb, s, d)                         # scale pre-folded
    k = (jnp.dot(x2, wk, preferred_element_type=jnp.float32)
         + bk_ref[...]).reshape(tb, s, d)
    v = (jnp.dot(x2, wv, preferred_element_type=jnp.float32)
         + bv_ref[...]).reshape(tb, s, d)

    # attention_scores = q @ k^T : batched contraction over D, no explicit
    # transpose (the MXU consumes k directly; XLU slot stays free).
    scores = jnp.einsum("bqd,bkd->bqk",
                        q.astype(matmul_dtype), k.astype(matmul_dtype),
                        preferred_element_type=jnp.float32)       # (TB, S, S)

    # Numerically stable softmax over the last axis; EUP approx reciprocal.
    m = jnp.max(scores, axis=-1, keepdims=True)
    e = jnp.exp(scores - m)
    denom = jnp.sum(e, axis=-1, keepdims=True)
    probs = e * pl.reciprocal(denom, approx=True)                 # (TB, S, S) f32

    # dropout on probs is identity in eval mode (see TODO at top)

    out = jnp.einsum("bqk,bkd->bqd",
                     probs.astype(matmul_dtype), v.astype(matmul_dtype),
                     preferred_element_type=jnp.float32)          # (TB, S, D)

    out_ref[...] = out.astype(out_ref.dtype)
    probs_ref[...] = probs.astype(probs_ref.dtype)


def _pick_batch_tile(B, S, H, D, budget_bytes=4 << 20):
    """Largest divisor of B whose f32 (x + out + probs) block fits the budget."""
    best = 1
    for tb in range(1, B + 1):
        if B % tb:
            continue
        if tb * S * (H + D + S) * 4 <= budget_bytes:
            best = tb
    # v7x has 2 TensorCores: prefer >=2 parallel grid steps when the resulting
    # per-step blocks are still comfortably large.
    if best == B and B > 1:
        half = next(t for t in range(B // 2, 0, -1) if B % t == 0)
        if half * S >= 256:
            best = half
    return best


def attention_head(x, wq, bq, wk, bk, wv, bv, *, matmul_dtype=jnp.bfloat16):
    """x: (B, S, H); w*: (H, D); b*: (D,). Returns (out (B,S,D), probs (B,S,S))."""
    B, S, H = x.shape
    D = wq.shape[1]

    # Fold the 1/sqrt(D) attention scale into the query projection at trace
    # time: scales H*D + D numbers once instead of S*S per grid step.
    scale = 1.0 / math.sqrt(D)
    wq_s = (wq * scale).astype(wq.dtype)
    bq_s = (bq * scale).astype(bq.dtype)

    # biases as (1, D) for a 2-D TPU-friendly layout
    bq2 = bq_s.reshape(1, D)
    bk2 = bk.reshape(1, D)
    bv2 = bv.reshape(1, D)

    TB = _pick_batch_tile(B, S, H, D)
    grid = (B // TB,)

    kernel = functools.partial(_attention_head_kernel, matmul_dtype=matmul_dtype)

    w_spec = pl.BlockSpec((H, D), lambda b: (0, 0))
    b_spec = pl.BlockSpec((1, D), lambda b: (0, 0))

    # Inputs/outputs are double-buffered by the pipeline; give the compiler an
    # explicit (bounded) VMEM budget. Cap at 56 MiB so v7x (64 MiB/TC) keeps
    # headroom for internal scratch; this also raises v5e's 16 MiB default.
    per_step_bytes = 2 * 4 * (TB * S * (H + D + S) + 3 * (H * D + D))
    vmem_limit = int(min(max(2 * per_step_bytes, 32 << 20), 56 << 20))

    out, probs = pl.pallas_call(
        kernel,
        out_shape=(
            jax.ShapeDtypeStruct((B, S, D), x.dtype),
            jax.ShapeDtypeStruct((B, S, S), x.dtype),
        ),
        grid_spec=pltpu.PrefetchScalarGridSpec(
            num_scalar_prefetch=0,
            grid=grid,
            in_specs=[
                pl.BlockSpec((TB, S, H), lambda b: (b, 0, 0)),  # x
                w_spec, b_spec,                                 # query (pre-scaled)
                w_spec, b_spec,                                 # key
                w_spec, b_spec,                                 # value
            ],
            out_specs=[
                pl.BlockSpec((TB, S, D), lambda b: (b, 0, 0)),
                pl.BlockSpec((TB, S, S), lambda b: (b, 0, 0)),
            ],
        ),
        compiler_params=pltpu.CompilerParams(
            dimension_semantics=("parallel",),
            vmem_limit_bytes=vmem_limit,
        ),
    )(x, wq_s, bq2, wk, bk2, wv, bv2)
    return out, probs


def _reference(x, wq, bq, wk, bk, wv, bv):
    q = x @ wq + bq
    k = x @ wk + bk
    v = x @ wv + bv
    scores = jnp.einsum("bqd,bkd->bqk", q, k) / math.sqrt(wq.shape[1])
    probs = jax.nn.softmax(scores, axis=-1)
    return probs @ v, probs


if __name__ == "__main__":
    B, S, H, D = 2, 8, 32, 16  # batch, seq, hidden_size, attention_head_size

    key = jax.random.PRNGKey(0)
    kx, kq, kk, kv, kbq, kbk, kbv = jax.random.split(key, 7)

    x = jax.random.normal(kx, (B, S, H), dtype=jnp.float32)

    # deterministic parameter init (mimics nn.Linear uniform(-1/sqrt(H), 1/sqrt(H)))
    bound = 1.0 / math.sqrt(H)
    wq = jax.random.uniform(kq, (H, D), jnp.float32, -bound, bound)
    wk = jax.random.uniform(kk, (H, D), jnp.float32, -bound, bound)
    wv = jax.random.uniform(kv, (H, D), jnp.float32, -bound, bound)
    bq = jax.random.uniform(kbq, (D,), jnp.float32, -bound, bound)
    bk = jax.random.uniform(kbk, (D,), jnp.float32, -bound, bound)
    bv = jax.random.uniform(kbv, (D,), jnp.float32, -bound, bound)

    out, probs = attention_head(x, wq, bq, wk, bk, wv, bv)
    out = jax.block_until_ready(out)
    probs = jax.block_until_ready(probs)

    ref_out, ref_probs = _reference(x, wq, bq, wk, bk, wv, bv)
    assert out.shape == (B, S, D) and probs.shape == (B, S, S)
    # bf16 matmul operands (f32 accumulation) + approx reciprocal shift results
    # by ~1e-3 relative vs. the f32 reference -> relaxed tolerances.
    assert jnp.allclose(out, ref_out, atol=2e-2, rtol=2e-2)
    assert jnp.allclose(probs, ref_probs, atol=2e-2, rtol=2e-2)
    assert jnp.allclose(jnp.sum(probs, axis=-1), 1.0, atol=1e-2)

    print("KERNEL_OK")
</pallas_src>

<mosaic_0001>
module attributes {stable_mosaic.version = 11 : i64} {
  func.func @_attention_head_kernel(%arg0: i32, %arg1: memref<2x8x32xf32, #tpu.memory_space<vmem>>, %arg2: memref<32x16xf32, #tpu.memory_space<vmem>>, %arg3: memref<1x16xf32, #tpu.memory_space<vmem>>, %arg4: memref<32x16xf32, #tpu.memory_space<vmem>>, %arg5: memref<1x16xf32, #tpu.memory_space<vmem>>, %arg6: memref<32x16xf32, #tpu.memory_space<vmem>>, %arg7: memref<1x16xf32, #tpu.memory_space<vmem>>, %arg8: memref<2x8x16xf32, #tpu.memory_space<vmem>>, %arg9: memref<2x8x8xf32, #tpu.memory_space<vmem>>) attributes {dimension_semantics = [#tpu.dimension_semantics<parallel>], iteration_bounds = array<i64: 1>, scalar_prefetch = 0 : i64, scratch_operands = 0 : i64, tpu.core_type = #tpu.core_type<tc>, window_params = [{transform_indices = @transform_0, window_bounds = array<i64: 2, 8, 32>}, {pipeline_mode = #tpu.pipeline_mode<synchronous>, transform_indices = @transform_1, window_bounds = array<i64: 32, 16>}, {pipeline_mode = #tpu.pipeline_mode<synchronous>, transform_indices = @transform_2, window_bounds = array<i64: 1, 16>}, {pipeline_mode = #tpu.pipeline_mode<synchronous>, transform_indices = @transform_3, window_bounds = array<i64: 32, 16>}, {pipeline_mode = #tpu.pipeline_mode<synchronous>, transform_indices = @transform_4, window_bounds = array<i64: 1, 16>}, {pipeline_mode = #tpu.pipeline_mode<synchronous>, transform_indices = @transform_5, window_bounds = array<i64: 32, 16>}, {pipeline_mode = #tpu.pipeline_mode<synchronous>, transform_indices = @transform_6, window_bounds = array<i64: 1, 16>}, {transform_indices = @transform_7, window_bounds = array<i64: 2, 8, 16>}, {transform_indices = @transform_8, window_bounds = array<i64: 2, 8, 8>}]} {
    %c0 = arith.constant 0 : index
    %c0_0 = arith.constant 0 : index
    %c0_1 = arith.constant 0 : index
    %0 = vector.load %arg1[%c0, %c0_0, %c0_1] : memref<2x8x32xf32, #tpu.memory_space<vmem>>, vector<2x8x32xf32>
    %1 = vector.shape_cast %0 : vector<2x8x32xf32> to vector<16x32xf32>
    %2 = arith.truncf %1 : vector<16x32xf32> to vector<16x32xbf16>
    %c0_2 = arith.constant 0 : index
    %c0_3 = arith.constant 0 : index
    %3 = vector.load %arg2[%c0_2, %c0_3] : memref<32x16xf32, #tpu.memory_space<vmem>>, vector<32x16xf32>
    %4 = arith.truncf %3 : vector<32x16xf32> to vector<32x16xbf16>
    %c0_4 = arith.constant 0 : index
    %c0_5 = arith.constant 0 : index
    %5 = vector.load %arg4[%c0_4, %c0_5] : memref<32x16xf32, #tpu.memory_space<vmem>>, vector<32x16xf32>
    %6 = arith.truncf %5 : vector<32x16xf32> to vector<32x16xbf16>
    %c0_6 = arith.constant 0 : index
    %c0_7 = arith.constant 0 : index
    %7 = vector.load %arg6[%c0_6, %c0_7] : memref<32x16xf32, #tpu.memory_space<vmem>>, vector<32x16xf32>
    %8 = arith.truncf %7 : vector<32x16xf32> to vector<32x16xbf16>
    %cst = arith.constant dense<0.000000e+00> : vector<16x16xf32>
    %9 = tpu.matmul %2, %4, %cst {dimension_numbers = #tpu.dot_dimension_numbers<[1], [0], [0], [1], [0, 0, 1, 1], [], []>} : vector<16x32xbf16>, vector<32x16xbf16>, vector<16x16xf32> -> vector<16x16xf32>
    %c0_8 = arith.constant 0 : index
    %c0_9 = arith.constant 0 : index
    %10 = vector.load %arg3[%c0_8, %c0_9] : memref<1x16xf32, #tpu.memory_space<vmem>>, vector<1x16xf32>
    %11 = vector.broadcast %10 : vector<1x16xf32> to vector<16x16xf32>
    %12 = arith.addf %9, %11 : vector<16x16xf32>
    %13 = vector.shape_cast %12 : vector<16x16xf32> to vector<2x8x16xf32>
    %cst_10 = arith.constant dense<0.000000e+00> : vector<16x16xf32>
    %14 = tpu.matmul %2, %6, %cst_10 {dimension_numbers = #tpu.dot_dimension_numbers<[1], [0], [0], [1], [0, 0, 1, 1], [], []>} : vector<16x32xbf16>, vector<32x16xbf16>, vector<16x16xf32> -> vector<16x16xf32>
    %c0_11 = arith.constant 0 : index
    %c0_12 = arith.constant 0 : index
    %15 = vector.load %arg5[%c0_11, %c0_12] : memref<1x16xf32, #tpu.memory_space<vmem>>, vector<1x16xf32>
    %16 = vector.broadcast %15 : vector<1x16xf32> to vector<16x16xf32>
    %17 = arith.addf %14, %16 : vector<16x16xf32>
    %18 = vector.shape_cast %17 : vector<16x16xf32> to vector<2x8x16xf32>
    %cst_13 = arith.constant dense<0.000000e+00> : vector<16x16xf32>
    %19 = tpu.matmul %2, %8, %cst_13 {dimension_numbers = #tpu.dot_dimension_numbers<[1], [0], [0], [1], [0, 0, 1, 1], [], []>} : vector<16x32xbf16>, vector<32x16xbf16>, vector<16x16xf32> -> vector<16x16xf32>
    %c0_14 = arith.constant 0 : index
    %c0_15 = arith.constant 0 : index
    %20 = vector.load %arg7[%c0_14, %c0_15] : memref<1x16xf32, #tpu.memory_space<vmem>>, vector<1x16xf32>
    %21 = vector.broadcast %20 : vector<1x16xf32> to vector<16x16xf32>
    %22 = arith.addf %19, %21 : vector<16x16xf32>
    %23 = vector.shape_cast %22 : vector<16x16xf32> to vector<2x8x16xf32>
    %24 = arith.truncf %13 : vector<2x8x16xf32> to vector<2x8x16xbf16>
    %25 = arith.truncf %18 : vector<2x8x16xf32> to vector<2x8x16xbf16>
    "tpu.trace_start"() <{level = 10 : i32, message = "bqd,bkd->bqk"}> : () -> ()
    %cst_16 = arith.constant dense<0.000000e+00> : vector<2x8x8xf32>
    %26 = tpu.matmul %24, %25, %cst_16 {dimension_numbers = #tpu.dot_dimension_numbers<[2], [2], [1], [1], [0, 0, 0, 1, 1, 1], [0], [0]>} : vector<2x8x16xbf16>, vector<2x8x16xbf16>, vector<2x8x8xf32> -> vector<2x8x8xf32>
    "tpu.trace_stop"() : () -> ()
    %cst_17 = arith.constant dense<0xFF800000> : vector<2x8xf32>
    %27 = vector.multi_reduction <maximumf>, %26, %cst_17 [2] : vector<2x8x8xf32> to vector<2x8xf32>
    %28 = vector.shape_cast %27 : vector<2x8xf32> to vector<2x8x1xf32>
    %29 = vector.broadcast %28 : vector<2x8x1xf32> to vector<2x8x8xf32>
    %30 = arith.subf %26, %29 : vector<2x8x8xf32>
    %31 = math.exp %30 : vector<2x8x8xf32>
    %cst_18 = arith.constant dense<0.000000e+00> : vector<2x8xf32>
    %32 = vector.multi_reduction <add>, %31, %cst_18 [2] : vector<2x8x8xf32> to vector<2x8xf32>
    %33 = vector.shape_cast %32 : vector<2x8xf32> to vector<2x8x1xf32>
    %34 = tpu.reciprocal %33 {approx = true} : vector<2x8x1xf32> -> vector<2x8x1xf32>
    %35 = vector.broadcast %34 : vector<2x8x1xf32> to vector<2x8x8xf32>
    %36 = arith.mulf %31, %35 : vector<2x8x8xf32>
    %37 = arith.truncf %36 : vector<2x8x8xf32> to vector<2x8x8xbf16>
    %38 = arith.truncf %23 : vector<2x8x16xf32> to vector<2x8x16xbf16>
    "tpu.trace_start"() <{level = 10 : i32, message = "bqk,bkd->bqd"}> : () -> ()
    %cst_19 = arith.constant dense<0.000000e+00> : vector<2x8x16xf32>
    %39 = tpu.matmul %37, %38, %cst_19 {dimension_numbers = #tpu.dot_dimension_numbers<[2], [1], [1], [2], [0, 0, 0, 1, 1, 2], [0], [0]>} : vector<2x8x8xbf16>, vector<2x8x16xbf16>, vector<2x8x16xf32> -> vector<2x8x16xf32>
    "tpu.trace_stop"() : () -> ()
    %c0_20 = arith.constant 0 : index
    %c0_21 = arith.constant 0 : index
    %c0_22 = arith.constant 0 : index
    %40 = vector.load %arg8[%c0_20, %c0_21, %c0_22] : memref<2x8x16xf32, #tpu.memory_space<vmem>>, vector<2x8x16xf32>
    tpu.vector_store %arg8[%c0_20, %c0_21, %c0_22], %39 {strides = array<i32>} : memref<2x8x16xf32, #tpu.memory_space<vmem>>, vector<2x8x16xf32>,
    %c0_23 = arith.constant 0 : index
    %c0_24 = arith.constant 0 : index
    %c0_25 = arith.constant 0 : index
    %41 = vector.load %arg9[%c0_23, %c0_24, %c0_25] : memref<2x8x8xf32, #tpu.memory_space<vmem>>, vector<2x8x8xf32>
    tpu.vector_store %arg9[%c0_23, %c0_24, %c0_25], %36 {strides = array<i32>} : memref<2x8x8xf32, #tpu.memory_space<vmem>>, vector<2x8x8xf32>,
    return
  }
  func.func @transform_0(%arg0: i32) -> (i32, i32, i32) {
    %c0_i32 = arith.constant 0 : i32
    %c0_i32_0 = arith.constant 0 : i32
    %c0_i32_1 = arith.constant 0 : i32
    return %arg0, %c0_i32, %c0_i32_0 : i32, i32, i32
  }
  func.func @transform_1(%arg0: i32) -> (i32, i32) {
    %c0_i32 = arith.constant 0 : i32
    %c0_i32_0 = arith.constant 0 : i32
    %c0_i32_1 = arith.constant 0 : i32
    return %c0_i32, %c0_i32_0 : i32, i32
  }
  func.func @transform_2(%arg0: i32) -> (i32, i32) {
    %c0_i32 = arith.constant 0 : i32
    %c0_i32_0 = arith.constant 0 : i32
    %c0_i32_1 = arith.constant 0 : i32
    return %c0_i32, %c0_i32_0 : i32, i32
  }
  func.func @transform_3(%arg0: i32) -> (i32, i32) {
    %c0_i32 = arith.constant 0 : i32
    %c0_i32_0 = arith.constant 0 : i32
    %c0_i32_1 = arith.constant 0 : i32
    return %c0_i32, %c0_i32_0 : i32, i32
  }
  func.func @transform_4(%arg0: i32) -> (i32, i32) {
    %c0_i32 = arith.constant 0 : i32
    %c0_i32_0 = arith.constant 0 : i32
    %c0_i32_1 = arith.constant 0 : i32
    return %c0_i32, %c0_i32_0 : i32, i32
  }
  func.func @transform_5(%arg0: i32) -> (i32, i32) {
    %c0_i32 = arith.constant 0 : i32
    %c0_i32_0 = arith.constant 0 : i32
    %c0_i32_1 = arith.constant 0 : i32
    return %c0_i32, %c0_i32_0 : i32, i32
  }
  func.func @transform_6(%arg0: i32) -> (i32, i32) {
    %c0_i32 = arith.constant 0 : i32
    %c0_i32_0 = arith.constant 0 : i32
    %c0_i32_1 = arith.constant 0 : i32
    return %c0_i32, %c0_i32_0 : i32, i32
  }
  func.func @transform_7(%arg0: i32) -> (i32, i32, i32) {
    %c0_i32 = arith.constant 0 : i32
    %c0_i32_0 = arith.constant 0 : i32
    %c0_i32_1 = arith.constant 0 : i32
    return %arg0, %c0_i32, %c0_i32_0 : i32, i32, i32
  }
  func.func @transform_8(%arg0: i32) -> (i32, i32, i32) {
    %c0_i32 = arith.constant 0 : i32
    %c0_i32_0 = arith.constant 0 : i32
    %c0_i32_1 = arith.constant 0 : i32
    return %arg0, %c0_i32, %c0_i32_0 : i32, i32, i32
  }
}

</mosaic_0001>

<bundles_post_ra>
// kernel: tpu_custom_call.1
= control target key start
LH: loop header
LB: loop body
LE: loop exit
PB: predicated region body
PF: predicated region fallthrough
CT: control target
= control target key end

     0   :  { %14 = vsyncpa [#allocation3], 0  ;;  %v590_v3 = vmov 0.0   ;;  %vm591_vm0 = vmmov 0   ;;  %s763_s0 = inlined_call_operand.vmem [shape: f32[2,8,32], index: 0, kind: input, shape index: {}]   ;;  %s764_s1 = inlined_call_operand.vmem [shape: f32[32,16], index: 1, kind: input, shape index: {}]   ;;  %s765_s2 = inlined_call_operand.vmem [shape: f32[1,16], index: 2, kind: input, shape index: {}]   ;;  %s766_s3 = inlined_call_operand.vmem [shape: f32[32,16], index: 3, kind: input, shape index: {}]   ;;  %s767_s4 = inlined_call_operand.vmem [shape: f32[1,16], index: 4, kind: input, shape index: {}]   ;;  %s768_s5 = inlined_call_operand.vmem [shape: f32[32,16], index: 5, kind: input, shape index: {}]   ;;  %s769_s6 = inlined_call_operand.vmem [shape: f32[1,16], index: 6, kind: input, shape index: {}]   ;;  %s770_s7 = inlined_call_operand.hbm [shape: f32[2,8,16], index: 7, kind: output, shape index: {0}]   ;;  %s771_s8 = inlined_call_operand.hbm [shape: f32[2,8,8], index: 8, kind: output, shape index: {1}]  }
   0x1   :  { %v40_v0 = vld [vmem:[%s766_s3] sm:$0xff]  ;;  %v41_v1 = vld [vmem:[%s766_s3 + $0x8] sm:$0xff]  ;;  %v42_v2 = vld [vmem:[%s766_s3 + $0x10] sm:$0xff]  ;;  %488 = vmatprep.subr.bf16.mxu1 %v590_v3  ;;  %480 = vmatprep.subr.bf16.mxu0 %v590_v3 }
   0x2   :  { %v44_v4 = vpack.c.bf16 %v41_v1, %v40_v0  ;;  %v43_v5 = vld [vmem:[%s766_s3 + $0x18] sm:$0xff]  ;;  %v34_v6 = vld [vmem:[%s764_s1] sm:$0xff]  ;;  %v35_v7 = vld [vmem:[%s764_s1 + $0x8] sm:$0xff]  ;;  %492 = vmatprep.mubr.msk.bf16.mxu1 %vm591_vm0, %v590_v3  ;;  %484 = vmatprep.mubr.msk.bf16.mxu0 %vm591_vm0, %v590_v3 }
   0x3   :  { %v38_v8 = vpack.c.bf16 %v35_v7, %v34_v6  ;;  %v36_v9 = vld [vmem:[%s764_s1 + $0x10] sm:$0xff]  ;;  %v45_v10 = vpack.c.bf16 %v43_v5, %v42_v2  ;;  %v31_v11 = vld [vmem:[%s763_s0] sm:$0xff]  ;;  %v32_v12 = vld [vmem:[%s763_s0 + $0x8] sm:$0xff] }
   0x4   :  { %489 = vmatpush3.bf16.msra.mxu1 %v44_v4  ;;  %v37_v13 = vld [vmem:[%s764_s1 + $0x18] sm:$0xff]  ;;  %v46_v15 = vld [vmem:[%s768_s5] sm:$0xff]  ;;  %v47_v16 = vld [vmem:[%s768_s5 + $0x8] sm:$0xff] }
   0x5   :  { %490 = vmatprep.subr.bf16.mxu1 %v590_v3  ;;  %481 = vmatpush3.bf16.msra.mxu0 %v38_v8  ;;  %v39_v14 = vpack.c.bf16 %v37_v13, %v36_v9 }
   0x6   :  { %482 = vmatprep.subr.bf16.mxu0 %v590_v3 }
   0x7   :  { %15 = vsyncpa [#allocation5], 0  ;;  %v33_v17 = vpack.c.bf16 %v32_v12, %v31_v11  ;;  %vm59_vm1 = vcmask 261120   ;;  %v50_v18 = vpack.c.bf16 %v47_v16, %v46_v15  ;;  %v48_v19 = vld [vmem:[%s768_s5 + $0x10] sm:$0xff]  ;;  %v49_v20 = vld [vmem:[%s768_s5 + $0x18] sm:$0xff]  ;;  %vm204_vm2 = vcmask 130048  }
   0x8   :  { %491 = vmatpush3.bf16.msra.mxu1 %v45_v10  ;;  %v51_v21 = vpack.c.bf16 %v49_v20, %v48_v19  ;;  %v455_v22 = vld [vmem:[%s767_s4] ss:$0 sm:$0xff]  ;;  %vm327_vm3 = vcmask 1043456   ;;  %vm297_vm4 = vcmask 64512  }
   0x9   :  { %483 = vmatpush3.bf16.msra.mxu0 %v39_v14  ;;  %504 = vmatprep.subr.bf16.mxu1 %v590_v3  ;;  %v453_v28 = vld [vmem:[%s765_s2] ss:$0 sm:$0xff]  ;;  %s592_s2 = smov [#allocation4]  }
   0xa   :  { %496 = vmatprep.subr.bf16.mxu0 %v590_v3  ;;  %v457_v39 = vld [vmem:[%s769_s6] ss:$0 sm:$0xff]  ;;  %s438_s6 = sshll.u32 %s592_s2, 4  ;;  %s439_s6 = int_to_ptr.vmem [resolvable:$true] %s438_s6 }
   0xb   :  { %493 = vmatmul.mubr.msk.bf16.vlgmr.msra.gmra.mrb[0].mxu1 %vm59_vm1, %v33_v17  ;;  %s542_s12 = scalar_lea.vmem %s439_s6, 256  ;;  %p547_p1 = scmp.lt.s32.totalorder %s439_s6, %s439_s6 }
   0xc   :  { %485 = vmatmul.mubr.msk.bf16.vlgmr.msra.gmra.mrb[0].mxu0 %vm59_vm1, %v33_v17  ;;  %506 = vmatprep.mubr.msk.bf16.mxu1 %vm591_vm0, %v590_v3  ;;  %p543_p0 = scmp.ne.s32.totalorder %s439_s6, %s542_s12  ;;  %p548_p2 = scmp.lt.s32.totalorder %s542_s12, %s542_s12 }
   0xd   :  { %497 = vmatpush3.bf16.msra.mxu0 %v50_v18  ;;  %500 = vmatprep.mubr.msk.bf16.mxu0 %vm591_vm0, %v590_v3 }
   0xe   :  { %498 = vmatprep.subr.bf16.mxu0 %v590_v3  ;;  %p549_p3 = por %p548_p2, %p547_p1 }
  0x10   :  { %p550_p4 = pnand %p549_p3, %p543_p0 }
  0x11   :  { %499 = vmatpush3.bf16.msra.mxu0 %v51_v21 }
  0x12   :  { %510 = vmatprep.subr.bf16.mxu0 %v590_v3 }
  0x14   :  { %501 = vmatmul.mubr.msk.bf16.vlgmr.msra.gmra.mrb[4].mxu0 %vm59_vm1, %v33_v17 }
  0x15   :  { %512 = vmatprep.mubr.msk.bf16.mxu0 %vm591_vm0, %v590_v3 }
  0xde   :  { %v145_v23 = vpop.f32.mrb[0].mxu1 }
  0xdf   :  { %v146_v24 = vadd.f32 %v455_v22, %v145_v23  ;;  %v494_v25 = vpop.f32.mrb[1].mxu1  ;;  %v97_v26 = vpop.f32.mrb[0].mxu0 }
  0xe0   :  { %v148_v27 = vpop.f32.mrb[2].mxu1  ;;  %v486_v29 = vpop.f32.mrb[1].mxu0  ;;  %v98_v37 = vadd.f32 %v453_v28, %v97_v26 }
  0xe1   :  { %v202_v30 = vpack.c.bf16 %v146_v24, %v146_v24  ;;  %v149_v31 = vadd.f32 %v455_v22, %v148_v27  ;;  %v495_v32 = vpop.f32.mrb[3].mxu1  ;;  %v100_v33 = vpop.f32.mrb[2].mxu0 }
  0xe2   :  { %v487_v34 = vpop.f32.mrb[3].mxu0  ;;  %v200_v40 = vpack.c.bf16 %v98_v37, %v98_v37  ;;  %v101_v41 = vadd.f32 %v453_v28, %v100_v33 }
  0xe3   :  { %v209_v35 = vsel %vm204_vm2, %v202_v30, 0  ;;  %v203_v36 = vpack.c.bf16 %v149_v31, %v149_v31 }
  0xe4   :  { %505 = vmatpush3.bf16.xpose.msra.mxu1 %v209_v35  ;;  %v201_v49 = vpack.c.bf16 %v101_v41, %v101_v41 }
  0xe5   :  { %v255_v38 = vsel %vm204_vm2, %v203_v36, 0  ;;  %516 = vmatprep.subr.bf16.mxu1 %v590_v3 }
  0xe6   :  { %511 = vmatpush3.bf16.xpose.msra.mxu0 %v255_v38 }
  0xe7   :  { %v193_v42 = vpop.f32.mrb[4].mxu0  ;;  %522 = vmatprep.subr.bf16.mxu0 %v590_v3 }
  0xe8   :  { %v194_v43 = vadd.f32 %v457_v39, %v193_v42  ;;  %v502_v44 = vpop.f32.mrb[5].mxu0 }
  0xe9   :  { %v196_v45 = vpop.f32.mrb[6].mxu0 }
  0xea   :  { %v322_v46 = vpack.c.bf16 %v194_v43, %v194_v43  ;;  %v197_v47 = vadd.f32 %v457_v39, %v196_v45  ;;  %v503_v48 = vpop.f32.mrb[7].mxu0 }
  0xeb   :  { %507 = vmatmul.mubr.msk.bf16.vlgmr.msra.gmra.mrb[4].mxu1 %vm204_vm2, %v200_v40 }
  0xec   :  { %v329_v50 = vsel %vm327_vm3, %v322_v46, 0  ;;  %v323_v51 = vpack.c.bf16 %v197_v47, %v197_v47  ;;  %518 = vmatprep.mubr.msk.bf16.mxu1 %vm591_vm0, %v590_v3 }
  0xed   :  { %513 = vmatmul.mubr.msk.bf16.vlgmr.msra.gmra.mrb[8].mxu0 %vm204_vm2, %v201_v49  ;;  %517 = vmatpush3.bf16.msra.mxu1 %v329_v50 }
  0xee   :  { %v375_v52 = vsel %vm327_vm3, %v323_v51, 0  ;;  %524 = vmatprep.mubr.msk.bf16.mxu0 %vm591_vm0, %v590_v3 }
  0xef   :  { %523 = vmatpush3.bf16.msra.mxu0 %v375_v52 }
 0x1be   :  { %v245_v53 = vpop.f32.mrb[4].mxu1 }
 0x1bf   :  { %v508_v54 = vpop.f32.mrb[5].mxu1  ;;  %v298_v55 = vsel %vm297_vm4, %v245_v53, -inf }
 0x1c0   :  { %299 = vmax.xlane.f32.xlu0 %v298_v55  ;;  %v248_v56 = vpop.f32.mrb[6].mxu1  ;;  %v291_v57 = vpop.f32.mrb[8].mxu0 }
 0x1c1   :  { %v509_v58 = vpop.f32.mrb[7].mxu1  ;;  %v514_v59 = vpop.f32.mrb[9].mxu0  ;;  %v301_v62 = vsel %vm297_vm4, %v291_v57, -inf }
 0x1c2   :  { %v294_v60 = vpop.f32.mrb[10].mxu0 }
 0x1c3   :  { %v515_v61 = vpop.f32.mrb[11].mxu0 }
 0x1c4   :  { %302 = vmax.xlane.f32.xlu0 %v301_v62 }
 0x24d   :  { %v300_v63 = vpop.xlane.xlu0 %299 }
 0x24e   :  { %v304_v0 = vsub.f32 %v245_v53, %v300_v63 }
 0x250   :  { %v306_v1 = vmul.f32 1.442695, %v304_v0 }
 0x251   :  { %v303_v2 = vpop.xlane.xlu0 %302 }
 0x252   :  { %534 = vpow2.f32 %v306_v1  ;;  %v305_v3 = vsub.f32 %v291_v57, %v303_v2 }
 0x254   :  { %v308_v4 = vmul.f32 1.442695, %v305_v3 }
 0x256   :  { %536 = vpow2.f32 %v308_v4 }
 0x25c   :  { %v535_v5 = vpop.eup %534 }
 0x25d   :  { %v310_v6 = vsel %vm297_vm4, %v535_v5, 0.0 }
 0x25e   :  { %311 = vadd.xlane.f32.xlu1 %v310_v6 }
 0x260   :  { %v537_v7 = vpop.eup %536 }
 0x261   :  { %v313_v8 = vsel %vm297_vm4, %v537_v7, 0.0 }
 0x262   :  { %314 = vadd.xlane.f32.xlu1 %v313_v8 }
 0x2eb   :  { %v312_v9 = vpop.xlane.xlu1 %311 }
 0x2ec   :  { %538 = vrcp.f32 %v312_v9 }
 0x2ef   :  { %v315_v10 = vpop.xlane.xlu1 %314 }
 0x2f0   :  { %540 = vrcp.f32 %v315_v10 }
 0x2f6   :  { %v539_v11 = vpop.eup %538 }
 0x2f7   :  { %v318_v12 = vmul.f32 %v539_v11, %v535_v5 }
 0x2f9   :  { %419 = vst.msk [vmem:[#allocation4] sm:$0xff] %vm297_vm4, %v318_v12  ;;  %v320_v13 = vpack.c.bf16 %v318_v12, %v318_v12 }
 0x2fa   :  { %v541_v14 = vpop.eup %540 }
 0x2fb   :  { %v319_v15 = vmul.f32 %v541_v14, %v537_v7  ;;  %519 = vmatmul.mubr.msk.bf16.vlgmr.msra.gmra.mrb[8].mxu1 %vm297_vm4, %v320_v13 }
 0x2fd   :  { %420 = vst.msk [vmem:[#allocation4 + $0x8] sm:$0xff] %vm297_vm4, %v319_v15  ;;  %v321_v16 = vpack.c.bf16 %v319_v15, %v319_v15 }
 0x2ff   :  { %525 = vmatmul.mubr.msk.bf16.vlgmr.msra.gmra.mrb[12].mxu0 %vm297_vm4, %v321_v16 }
 0x300   :  { %553 = shalt.err (!%p550_p4)
}
 0x301   :  { %s554_s15 = scalar_lea.hbm %s771_s8, 256 }
 0x302   :  { %p555_p5 = scmp.ne.s32.totalorder %s771_s8, %s554_s15  ;;  %p558_p6 = scmp.lt.u32.totalorder %s554_s15, %s771_s8 }
 0x304   :  { %p560_p7 = pnand %p558_p6, %p555_p5 }
 0x306   :  { %563 = shalt.err (!%p560_p7)
}
 0x307   :  { %s593_s19 = smov 128   ;;  %s594_s20 = smov 8  }
 0x308   :  { %444 = dma.vmem_to_hbm [thread:$0]  %s439_s6, 256, %s771_s8, [#allocation5], %s593_s19, %s593_s19, %s594_s20  }
 0x309   :  { %s595_s23 = smov [#allocation2]  }
 0x30a   :  { %s426_s24 = sshll.u32 %s595_s23, 4  ;;  %s427_s24 = int_to_ptr.vmem [resolvable:$true] %s426_s24 }
 0x30b   :  { %s564_s25 = scalar_lea.vmem %s427_s24, 256  ;;  %p569_p9 = scmp.lt.s32.totalorder %s427_s24, %s427_s24 }
 0x30c   :  { %p565_p8 = scmp.ne.s32.totalorder %s427_s24, %s564_s25  ;;  %p570_p10 = scmp.lt.s32.totalorder %s564_s25, %s564_s25 }
 0x30e   :  { %p571_p11 = por %p570_p10, %p569_p9 }
 0x310   :  { %p572_p12 = pnand %p571_p11, %p565_p8 }
 0x3ce   :  { %v365_v17 = vpop.f32.mrb[8].mxu1 }
 0x3cf   :  { %417 = vst.msk [vmem:[#allocation2] sm:$0xff] %vm204_vm2, %v365_v17  ;;  %v520_v18 = vpop.f32.mrb[9].mxu1 }
 0x3d0   :  { %v368_v19 = vpop.f32.mrb[10].mxu1 }
 0x3d1   :  { %v521_v20 = vpop.f32.mrb[11].mxu1 }
 0x3d2   :  { %v411_v21 = vpop.f32.mrb[12].mxu0 }
 0x3d3   :  { %418 = vst.msk [vmem:[#allocation2 + $0x8] sm:$0xff] %vm204_vm2, %v411_v21  ;;  %v526_v22 = vpop.f32.mrb[13].mxu0 }
 0x3d4   :  { %v414_v23 = vpop.f32.mrb[14].mxu0 }
 0x3d5   :  { %575 = shalt.err (!%p572_p12)
}
 0x3d6   :  { %s576_s27 = scalar_lea.hbm %s770_s7, 256 }
 0x3d7   :  { %p577_p13 = scmp.ne.s32.totalorder %s770_s7, %s576_s27  ;;  %p580_p0 = scmp.lt.u32.totalorder %s576_s27, %s770_s7 }
 0x3d9   :  { %p582_p1 = pnand %p580_p0, %p577_p13 }
 0x3db   :  { %585 = shalt.err (!%p582_p1)
}
 0x3dc   :  { %432 = dma.vmem_to_hbm [thread:$0]  %s427_s24, 256, %s770_s7, [#allocation3], %s593_s19, %s593_s19, %s594_s20   ;;  %v527_v24 = vpop.f32.mrb[15].mxu0 }
 0x3dd   :  { %586 = dma.done.wait [#allocation3], 256  }
 0x3de   :  { %587 = vsyncadd [#allocation3], 4294967040 }
 0x3df   :  { %588 = dma.done.wait [#allocation5], 256  }
 0x3e0   :  { %589 = vsyncadd [#allocation5], 4294967040 }
 0x3e1   :  { %451 = vsyncpa [#allocation3], 1 }
 0x3e2   :  { %452 = vsyncpa [#allocation5], 1 }

</bundles_post_ra>
